<compile_context>
chip_gen: v6e
topology: v6e:2x2x1
jax: 0.10.0
libtpu: 0.0.40
codegen_flags: <defaults>
</compile_context>

<pallas_src>
import functools

import jax
import jax.numpy as jnp
from jax.experimental import pallas as pl
from jax.experimental.pallas import tpu as pltpu


def _round_up(x, m):
    return ((x + m - 1) // m) * m


def _unary_mlp_kernel(x_ref, w1_ref, b1_ref, w2_ref, b2_ref, o_ref):
    # Layer 1: (TB, D_in_p) @ (D_in_p, H_p) in bf16 on the MXU, f32 accumulation.
    x = x_ref[...].astype(jnp.bfloat16)           # no-op if caller supplied bf16
    h = jnp.dot(x, w1_ref[...], preferred_element_type=jnp.float32)
    h = jnp.maximum(h + b1_ref[...], 0.0)         # bias + ReLU in f32 (padded cols stay 0)

    # Layer 2: (TB, H_p) @ (H_p, D_out_p) in bf16, f32 accumulation.
    logits = jnp.dot(h.astype(jnp.bfloat16), w2_ref[...],
                     preferred_element_type=jnp.float32)
    logits = logits + b2_ref[...]                 # padded classes carry a -1e30 bias

    # Numerically-stable softmax over the lane-dense (padded) class axis.
    m = jnp.max(logits, axis=-1, keepdims=True)
    e = jnp.exp(logits - m)
    denom = jnp.sum(e, axis=-1, keepdims=True)
    # Exact reciprocal so each row sums to 1 within f32 rounding.
    o_ref[...] = (e * pl.reciprocal(denom, approx=False)).astype(o_ref.dtype)


def _resident_spec(shape):
    # Constant index_map -> the block never changes; single-buffer it to halve VMEM.
    return pl.BlockSpec(shape, lambda i: (0, 0), pipeline_mode=pl.Buffered(1))


@functools.partial(jax.jit, static_argnames=("block_b",))
def unary_mlp(x, w1, b1, w2, b2, *, block_b=512):
    """x: (B, input_dim) f32 or bf16; w1: (input_dim, hidden); b1: (1, hidden);
    w2: (hidden, output_dim); b2: (1, output_dim). Returns (B, output_dim) f32."""
    B, D_in = x.shape
    H = w1.shape[1]
    D_out = w2.shape[1]

    # ---- Lane/MXU-dense padding: D_in, H, D_out -> multiples of 128 ------------------
    D_in_p = max(128, _round_up(D_in, 128))
    H_p = max(128, _round_up(H, 128))
    D_out_p = max(128, _round_up(D_out, 128))

    w1p = jnp.zeros((D_in_p, H_p), jnp.float32).at[:D_in, :H].set(w1.astype(jnp.float32))
    b1p = jnp.zeros((1, H_p), jnp.float32).at[:, :H].set(b1.astype(jnp.float32))
    w2p = jnp.zeros((H_p, D_out_p), jnp.float32).at[:H, :D_out].set(w2.astype(jnp.float32))
    b2p = jnp.full((1, D_out_p), -1e30, jnp.float32).at[:, :D_out].set(b2.astype(jnp.float32))

    # bf16 weights: halve resident VMEM / HBM traffic, run MXU at bf16 rate.
    w1b = w1p.astype(jnp.bfloat16)
    w2b = w2p.astype(jnp.bfloat16)

    # Accept bf16 x from the caller; do NOT add a standalone cast (extra HBM pass).
    x_bytes = 2 if x.dtype == jnp.bfloat16 else 4

    # ---- Batch tiling: even split, 16-row aligned (packed bf16 sublanes) -------------
    B16 = max(16, _round_up(B, 16))
    n_tiles = pl.cdiv(B16, block_b)
    TB = _round_up(pl.cdiv(B16, n_tiles), 16)
    # v7x megacore: split a single large tile so the "parallel" axis uses both TCs.
    if n_tiles == 1 and TB >= 256:
        n_tiles = 2
        TB = _round_up(pl.cdiv(B16, 2), 16)
    B_pad = n_tiles * TB
    if B_pad != B or D_in_p != D_in:
        x = jnp.pad(x, ((0, B_pad - B), (0, D_in_p - D_in)))

    # ---- VMEM budget: real buffer counts + in-kernel temporaries + 20% headroom ------
    resident = (w1b.size * 2 + w2b.size * 2 + b1p.size * 4 + b2p.size * 4)   # Buffered(1)
    tiles = 2 * TB * D_in_p * x_bytes + 2 * TB * D_out_p * 4                  # x / out (double)
    temps = TB * (H_p + 2 * D_out_p) * 4 + TB * (D_in_p + H_p) * 2            # h/logits/e + bf16 copies
    needed = int(1.2 * (resident + tiles + temps))
    try:
        vmem_cap = int(pltpu.get_tpu_info().vmem_capacity_bytes)
    except Exception:
        vmem_cap = 64 * 2**20  # conservative: v7x per-TC VMEM
    vmem_limit = max(needed, 16 * 2**20)
    vmem_limit = int(min(vmem_limit, vmem_cap - 8 * 2**20))
    # TODO(synk): if resident bf16 W1+W2 ever exceed ~40 MiB (huge hidden dims), switch to
    # a reduction grid axis (P3 accumulator) that streams W1 over D_in chunks and W2 over
    # H chunks instead of keeping both resident; not needed at these sizes.

    cost = pl.CostEstimate(
        flops=2 * B_pad * (D_in_p * H_p + H_p * D_out_p),
        transcendentals=B_pad * D_out_p,
        bytes_accessed=(B_pad * D_in_p * x_bytes + w1b.size * 2 + w2b.size * 2
                        + b1p.size * 4 + b2p.size * 4 + B_pad * D_out_p * 4),
    )

    out_padded = pl.pallas_call(
        _unary_mlp_kernel,
        out_shape=jax.ShapeDtypeStruct((B_pad, D_out_p), jnp.float32),
        grid_spec=pltpu.PrefetchScalarGridSpec(
            num_scalar_prefetch=0,
            grid=(n_tiles,),
            in_specs=[
                pl.BlockSpec((TB, D_in_p), lambda i: (i, 0)),   # x: batch-tiled, double-buffered
                _resident_spec((D_in_p, H_p)),                  # W1 (bf16), resident, single-buffered
                _resident_spec((1, H_p)),                       # b1
                _resident_spec((H_p, D_out_p)),                 # W2 (bf16)
                _resident_spec((1, D_out_p)),                   # b2
            ],
            out_specs=pl.BlockSpec((TB, D_out_p), lambda i: (i, 0)),
        ),
        compiler_params=pltpu.CompilerParams(
            dimension_semantics=("parallel",),
            vmem_limit_bytes=vmem_limit,
        ),
        cost_estimate=cost,
    )(x, w1b, b1p, w2b, b2p)

    return out_padded[:B, :D_out]


def init_params(key, input_dim, hidden_dim, output_dim):
    """Deterministic init mimicking PyTorch nn.Linear default (uniform +/- 1/sqrt(fan_in)).
    Weights are stored (in_features, out_features), i.e. transpose of nn.Linear.weight."""
    k1, k2, k3, k4 = jax.random.split(key, 4)
    bound1 = 1.0 / jnp.sqrt(jnp.float32(input_dim))
    bound2 = 1.0 / jnp.sqrt(jnp.float32(hidden_dim))
    w1 = jax.random.uniform(k1, (input_dim, hidden_dim), jnp.float32, -bound1, bound1)
    b1 = jax.random.uniform(k2, (1, hidden_dim), jnp.float32, -bound1, bound1)
    w2 = jax.random.uniform(k3, (hidden_dim, output_dim), jnp.float32, -bound2, bound2)
    b2 = jax.random.uniform(k4, (1, output_dim), jnp.float32, -bound2, bound2)
    return w1, b1, w2, b2


def reference_mlp(x, w1, b1, w2, b2):
    h = jnp.maximum(x @ w1 + b1, 0.0)
    logits = h @ w2 + b2
    return jax.nn.softmax(logits, axis=1)


if __name__ == "__main__":
    key = jax.random.PRNGKey(0)
    k_x, k_p, k_x2 = jax.random.split(key, 3)

    batch, input_dim, hidden_dim, output_dim = 8, 32, 32, 16
    x = jax.random.normal(k_x, (batch, input_dim), jnp.float32)
    w1, b1, w2, b2 = init_params(k_p, input_dim, hidden_dim, output_dim)

    out = jax.block_until_ready(unary_mlp(x, w1, b1, w2, b2))
    ref = reference_mlp(x, w1, b1, w2, b2)
    assert out.shape == (batch, output_dim)
    # bf16 MXU operands -> compare to f32 reference with loose tolerance.
    assert jnp.allclose(out, ref, atol=2e-2, rtol=2e-2)
    assert jnp.allclose(jnp.sum(out, axis=1), jnp.ones((batch,)), atol=1e-3)

    # Second check: ragged batch with a multi-step grid (exercises tiling + padding
    # and the single-buffered resident weights across grid steps).
    batch2 = 40
    x2 = jax.random.normal(k_x2, (batch2, input_dim), jnp.float32)
    out2 = jax.block_until_ready(unary_mlp(x2, w1, b1, w2, b2, block_b=16))
    ref2 = reference_mlp(x2, w1, b1, w2, b2)
    assert out2.shape == (batch2, output_dim)
    assert jnp.allclose(out2, ref2, atol=2e-2, rtol=2e-2)
    assert jnp.allclose(jnp.sum(out2, axis=1), jnp.ones((batch2,)), atol=1e-3)

    print("KERNEL_OK")
</pallas_src>

<mosaic_0001>
module attributes {stable_mosaic.version = 11 : i64} {
  func.func @_unary_mlp_kernel(%arg0: i32, %arg1: memref<16x128xf32, #tpu.memory_space<vmem>>, %arg2: memref<128x128xbf16, #tpu.memory_space<vmem>>, %arg3: memref<1x128xf32, #tpu.memory_space<vmem>>, %arg4: memref<128x128xbf16, #tpu.memory_space<vmem>>, %arg5: memref<1x128xf32, #tpu.memory_space<vmem>>, %arg6: memref<16x128xf32, #tpu.memory_space<vmem>>) attributes {dimension_semantics = [#tpu.dimension_semantics<parallel>], iteration_bounds = array<i64: 1>, scalar_prefetch = 0 : i64, scratch_operands = 0 : i64, tpu.core_type = #tpu.core_type<tc>, window_params = [{transform_indices = @transform_0, window_bounds = array<i64: 16, 128>}, {pipeline_mode = #tpu.pipeline_mode<synchronous>, transform_indices = @transform_1, window_bounds = array<i64: 128, 128>}, {pipeline_mode = #tpu.pipeline_mode<synchronous>, transform_indices = @transform_2, window_bounds = array<i64: 1, 128>}, {pipeline_mode = #tpu.pipeline_mode<synchronous>, transform_indices = @transform_3, window_bounds = array<i64: 128, 128>}, {pipeline_mode = #tpu.pipeline_mode<synchronous>, transform_indices = @transform_4, window_bounds = array<i64: 1, 128>}, {transform_indices = @transform_5, window_bounds = array<i64: 16, 128>}]} {
    %c0 = arith.constant 0 : index
    %c0_0 = arith.constant 0 : index
    %0 = vector.load %arg1[%c0, %c0_0] : memref<16x128xf32, #tpu.memory_space<vmem>>, vector<16x128xf32>
    %1 = arith.truncf %0 : vector<16x128xf32> to vector<16x128xbf16>
    %c0_1 = arith.constant 0 : index
    %c0_2 = arith.constant 0 : index
    %2 = vector.load %arg2[%c0_1, %c0_2] : memref<128x128xbf16, #tpu.memory_space<vmem>>, vector<128x128xbf16>
    %cst = arith.constant dense<0.000000e+00> : vector<16x128xf32>
    %3 = tpu.matmul %1, %2, %cst {dimension_numbers = #tpu.dot_dimension_numbers<[1], [0], [0], [1], [0, 0, 1, 1], [], []>} : vector<16x128xbf16>, vector<128x128xbf16>, vector<16x128xf32> -> vector<16x128xf32>
    %c0_3 = arith.constant 0 : index
    %c0_4 = arith.constant 0 : index
    %4 = vector.load %arg3[%c0_3, %c0_4] : memref<1x128xf32, #tpu.memory_space<vmem>>, vector<1x128xf32>
    %5 = vector.broadcast %4 : vector<1x128xf32> to vector<16x128xf32>
    %6 = arith.addf %3, %5 : vector<16x128xf32>
    %cst_5 = arith.constant 0.000000e+00 : f32
    %7 = vector.broadcast %cst_5 : f32 to vector<16x128xf32>
    %8 = arith.maximumf %6, %7 : vector<16x128xf32>
    %9 = arith.truncf %8 : vector<16x128xf32> to vector<16x128xbf16>
    %c0_6 = arith.constant 0 : index
    %c0_7 = arith.constant 0 : index
    %10 = vector.load %arg4[%c0_6, %c0_7] : memref<128x128xbf16, #tpu.memory_space<vmem>>, vector<128x128xbf16>
    %cst_8 = arith.constant dense<0.000000e+00> : vector<16x128xf32>
    %11 = tpu.matmul %9, %10, %cst_8 {dimension_numbers = #tpu.dot_dimension_numbers<[1], [0], [0], [1], [0, 0, 1, 1], [], []>} : vector<16x128xbf16>, vector<128x128xbf16>, vector<16x128xf32> -> vector<16x128xf32>
    %c0_9 = arith.constant 0 : index
    %c0_10 = arith.constant 0 : index
    %12 = vector.load %arg5[%c0_9, %c0_10] : memref<1x128xf32, #tpu.memory_space<vmem>>, vector<1x128xf32>
    %13 = vector.broadcast %12 : vector<1x128xf32> to vector<16x128xf32>
    %14 = arith.addf %11, %13 : vector<16x128xf32>
    %cst_11 = arith.constant dense<0xFF800000> : vector<16xf32>
    %15 = vector.multi_reduction <maximumf>, %14, %cst_11 [1] : vector<16x128xf32> to vector<16xf32>
    %16 = vector.shape_cast %15 : vector<16xf32> to vector<16x1xf32>
    %17 = vector.broadcast %16 : vector<16x1xf32> to vector<16x128xf32>
    %18 = arith.subf %14, %17 : vector<16x128xf32>
    %19 = math.exp %18 : vector<16x128xf32>
    %cst_12 = arith.constant dense<0.000000e+00> : vector<16xf32>
    %20 = vector.multi_reduction <add>, %19, %cst_12 [1] : vector<16x128xf32> to vector<16xf32>
    %21 = vector.shape_cast %20 : vector<16xf32> to vector<16x1xf32>
    %22 = tpu.reciprocal %21 : vector<16x1xf32> -> vector<16x1xf32>
    %23 = vector.broadcast %22 : vector<16x1xf32> to vector<16x128xf32>
    %24 = arith.mulf %19, %23 : vector<16x128xf32>
    %c0_13 = arith.constant 0 : index
    %c0_14 = arith.constant 0 : index
    %25 = vector.load %arg6[%c0_13, %c0_14] : memref<16x128xf32, #tpu.memory_space<vmem>>, vector<16x128xf32>
    tpu.vector_store %arg6[%c0_13, %c0_14], %24 {strides = array<i32>} : memref<16x128xf32, #tpu.memory_space<vmem>>, vector<16x128xf32>,
    return
  }
  func.func @transform_0(%arg0: i32) -> (i32, i32) {
    %c0_i32 = arith.constant 0 : i32
    %c0_i32_0 = arith.constant 0 : i32
    return %arg0, %c0_i32 : i32, i32
  }
  func.func @transform_1(%arg0: i32) -> (i32, i32) {
    %c0_i32 = arith.constant 0 : i32
    %c0_i32_0 = arith.constant 0 : i32
    %c0_i32_1 = arith.constant 0 : i32
    return %c0_i32, %c0_i32_0 : i32, i32
  }
  func.func @transform_2(%arg0: i32) -> (i32, i32) {
    %c0_i32 = arith.constant 0 : i32
    %c0_i32_0 = arith.constant 0 : i32
    %c0_i32_1 = arith.constant 0 : i32
    return %c0_i32, %c0_i32_0 : i32, i32
  }
  func.func @transform_3(%arg0: i32) -> (i32, i32) {
    %c0_i32 = arith.constant 0 : i32
    %c0_i32_0 = arith.constant 0 : i32
    %c0_i32_1 = arith.constant 0 : i32
    return %c0_i32, %c0_i32_0 : i32, i32
  }
  func.func @transform_4(%arg0: i32) -> (i32, i32) {
    %c0_i32 = arith.constant 0 : i32
    %c0_i32_0 = arith.constant 0 : i32
    %c0_i32_1 = arith.constant 0 : i32
    return %c0_i32, %c0_i32_0 : i32, i32
  }
  func.func @transform_5(%arg0: i32) -> (i32, i32) {
    %c0_i32 = arith.constant 0 : i32
    %c0_i32_0 = arith.constant 0 : i32
    return %arg0, %c0_i32 : i32, i32
  }
}

</mosaic_0001>

<bundles_post_ra>
// kernel: unary_mlp.1
= control target key start
LH: loop header
LB: loop body
LE: loop exit
PB: predicated region body
PF: predicated region fallthrough
CT: control target
= control target key end

     0   :  { %v377_v0 = vmov 0.0   ;;  %vm378_vm0 = vmmov 0   ;;  %s475_s1 = inlined_call_operand.vmem [shape: bf16[128,128], index: 1, kind: input, shape index: {}]   ;;  %s476_s3 = inlined_call_operand.vmem [shape: bf16[128,128], index: 3, kind: input, shape index: {}]   ;;  %s477_s0 = inlined_call_operand.vmem [shape: f32[16,128], index: 0, kind: input, shape index: {}]   ;;  %s478_s2 = inlined_call_operand.vmem [shape: f32[1,128], index: 2, kind: input, shape index: {}]   ;;  %s479_s4 = inlined_call_operand.vmem [shape: f32[1,128], index: 4, kind: input, shape index: {}]   ;;  %s480_s5 = inlined_call_operand.vmem [shape: f32[16,128], index: 5, kind: output, shape index: {}]  }
   0x1   :  { %311 = vmatprep.subr.bf16.mxu0 %v377_v0  ;;  %v353_v1 = vld [vmem:[%s475_s1 + $0x38] sm:$0xff]   ;;  %327 = vmatprep.mubr.msk.bf16.mxu0 %vm378_vm0, %v377_v0  ;;  %v354_v2 = vld [vmem:[%s475_s1 + $0x30] sm:$0xff]   ;;  %v355_v3 = vld [vmem:[%s475_s1 + $0x28] sm:$0xff]  }
   0x2   :  { %331 = vmatprep.subr.bf16.mxu1 %v377_v0  ;;  %347 = vmatprep.mubr.msk.bf16.mxu1 %vm378_vm0, %v377_v0  ;;  %v361_v4 = vld [vmem:[%s476_s3 + $0x38] sm:$0xff]   ;;  %v356_v5 = vld [vmem:[%s475_s1 + $0x20] sm:$0xff]   ;;  %v362_v6 = vld [vmem:[%s476_s3 + $0x30] sm:$0xff]  }
   0x3   :  { %312 = vmatpush3.bf16.msra.mxu0 %v353_v1  ;;  %332 = vmatpush3.bf16.msra.mxu1 %v361_v4  ;;  %v357_v7 = vld [vmem:[%s475_s1 + $0x18] sm:$0xff]   ;;  %v363_v8 = vld [vmem:[%s476_s3 + $0x28] sm:$0xff]   ;;  %v358_v9 = vld [vmem:[%s475_s1 + $0x10] sm:$0xff]  }
   0x4   :  { %313 = vmatprep.subr.bf16.mxu0 %v377_v0  ;;  %333 = vmatprep.subr.bf16.mxu1 %v377_v0  ;;  %v364_v10 = vld [vmem:[%s476_s3 + $0x20] sm:$0xff]   ;;  %v359_v11 = vld [vmem:[%s475_s1 + $0x8] sm:$0xff]   ;;  %v365_v12 = vld [vmem:[%s476_s3 + $0x18] sm:$0xff]  }
   0x5   :  { %v360_v13 = vld [vmem:[%s475_s1] sm:$0xff]   ;;  %v22_v15 = vld [vmem:[%s477_s0 + $0x8] sm:$0xff]  ;;  %v366_v17 = vld [vmem:[%s476_s3 + $0x10] sm:$0xff]  }
   0x6   :  { %v21_v14 = vld [vmem:[%s477_s0] sm:$0xff]  ;;  %v367_v18 = vld [vmem:[%s476_s3 + $0x8] sm:$0xff]  }
   0x7   :  { %314 = vmatpush3.bf16.msra.mxu0 %v354_v2  ;;  %334 = vmatpush3.bf16.msra.mxu1 %v362_v6  ;;  %v23_v16 = vpack.c.bf16 %v22_v15, %v21_v14  ;;  %v368_v19 = vld [vmem:[%s476_s3] sm:$0xff]  }
   0x8   :  { %315 = vmatprep.subr.bf16.mxu0 %v377_v0  ;;  %335 = vmatprep.subr.bf16.mxu1 %v377_v0  ;;  %v275_v20 = vld [vmem:[%s478_s2] ss:$0 sm:$0xff] }
   0x9   :  { %v284_v30 = vld [vmem:[%s479_s4] ss:$0 sm:$0xff] }
   0xb   :  { %316 = vmatpush3.bf16.msra.mxu0 %v355_v3  ;;  %336 = vmatpush3.bf16.msra.mxu1 %v363_v8 }
   0xc   :  { %317 = vmatprep.subr.bf16.mxu0 %v377_v0  ;;  %337 = vmatprep.subr.bf16.mxu1 %v377_v0 }
   0xf   :  { %318 = vmatpush3.bf16.msra.mxu0 %v356_v5  ;;  %338 = vmatpush3.bf16.msra.mxu1 %v364_v10 }
  0x10   :  { %319 = vmatprep.subr.bf16.mxu0 %v377_v0  ;;  %339 = vmatprep.subr.bf16.mxu1 %v377_v0 }
  0x13   :  { %320 = vmatpush3.bf16.msra.mxu0 %v357_v7  ;;  %340 = vmatpush3.bf16.msra.mxu1 %v365_v12 }
  0x14   :  { %321 = vmatprep.subr.bf16.mxu0 %v377_v0  ;;  %341 = vmatprep.subr.bf16.mxu1 %v377_v0 }
  0x17   :  { %322 = vmatpush3.bf16.msra.mxu0 %v358_v9  ;;  %342 = vmatpush3.bf16.msra.mxu1 %v366_v17 }
  0x18   :  { %323 = vmatprep.subr.bf16.mxu0 %v377_v0  ;;  %343 = vmatprep.subr.bf16.mxu1 %v377_v0 }
  0x1b   :  { %324 = vmatpush3.bf16.msra.mxu0 %v359_v11  ;;  %344 = vmatpush3.bf16.msra.mxu1 %v367_v18 }
  0x1c   :  { %325 = vmatprep.subr.bf16.mxu0 %v377_v0  ;;  %345 = vmatprep.subr.bf16.mxu1 %v377_v0 }
  0x1f   :  { %326 = vmatpush3.bf16.msra.mxu0 %v360_v13  ;;  %346 = vmatpush3.bf16.msra.mxu1 %v368_v19 }
  0x22   :  { %328 = vmatmul.mubr.bf16.vlgmr.msra.gmra.mxu0 %v23_v16 }
  0xe2   :  { %v129_v21 = vpop.f32.mrf.mxu0 }
  0xe3   :  { %v130_v23 = vadd.f32 %v275_v20, %v129_v21 }
  0xe4   :  { %v329_v22 = vpop.f32.mrf.mxu0 }
  0xe5   :  { %v136_v27 = vmax.f32 %v130_v23, 0.0 }
  0xe6   :  { %v132_v24 = vpop.f32.mrf.mxu0 }
  0xe7   :  { %v133_v25 = vadd.f32 %v275_v20, %v132_v24 }
  0xe8   :  { %v330_v26 = vpop.f32.mrf.mxu0 }
  0xe9   :  { %v137_v28 = vmax.f32 %v133_v25, 0.0 }
  0xeb   :  { %v138_v29 = vpack.c.bf16 %v137_v28, %v136_v27 }
  0xed   :  { %348 = vmatmul.mubr.bf16.vlgmr.msra.gmra.mxu1 %v138_v29 }
 0x1ad   :  { %v244_v31 = vpop.f32.mrf.mxu1 }
 0x1ae   :  { %v245_v32 = vadd.f32 %v284_v30, %v244_v31 }
 0x1af   :  { %v349_v33 = vpop.f32.mrf.mxu1 }
 0x1b0   :  { %251 = vmax.xlane.f32.xlu0 %v245_v32 }
 0x1b1   :  { %v247_v34 = vpop.f32.mrf.mxu1 }
 0x1b2   :  { %v248_v35 = vadd.f32 %v284_v30, %v247_v34 }
 0x1b3   :  { %v350_v36 = vpop.f32.mrf.mxu1 }
 0x1b4   :  { %253 = vmax.xlane.f32.xlu0 %v248_v35 }
 0x239   :  { %v252_v37 = vpop.xlane.xlu0 %251 }
 0x23a   :  { %v255_v38 = vsub.f32 %v245_v32, %v252_v37 }
 0x23c   :  { %v257_v39 = vmul.f32 1.442695, %v255_v38 }
 0x23d   :  { %v254_v40 = vpop.xlane.xlu0 %253 }
 0x23e   :  { %369 = vpow2.f32 %v257_v39  ;;  %v256_v41 = vsub.f32 %v248_v35, %v254_v40 }
 0x240   :  { %v259_v42 = vmul.f32 1.442695, %v256_v41 }
 0x242   :  { %371 = vpow2.f32 %v259_v42 }
 0x24b   :  { %v370_v43 = vpop.eup %369 }
 0x24c   :  { %261 = vadd.xlane.f32.xlu1 %v370_v43 }
 0x24f   :  { %v372_v44 = vpop.eup %371 }
 0x250   :  { %263 = vadd.xlane.f32.xlu1 %v372_v44 }
 0x2d5   :  { %v262_v45 = vpop.xlane.xlu1 %261 }
 0x2d6   :  { %373 = vrcp.f32 %v262_v45 }
 0x2d9   :  { %v264_v46 = vpop.xlane.xlu1 %263 }
 0x2da   :  { %375 = vrcp.f32 %v264_v46 }
 0x2e3   :  { %v374_v47 = vpop.eup %373 }
 0x2e4   :  { %v267_v48 = vmul.f32 %v374_v47, %v370_v43 }
 0x2e6   :  { %269 = vst [vmem:[%s480_s5] sm:$0xff] %v267_v48 }
 0x2e7   :  { %v376_v49 = vpop.eup %375 }
 0x2e8   :  { %v268_v50 = vmul.f32 %v376_v49, %v372_v44 }
 0x2ea   :  { %270 = vst [vmem:[%s480_s5 + $0x8] sm:$0xff] %v268_v50 }

</bundles_post_ra>
